<compile_context>
chip_gen: v7x
topology: tpu7x:2x2x1
jax: 0.10.0
libtpu: 0.0.40
codegen_flags: <defaults>
</compile_context>

<pallas_src>
import functools

import jax
import jax.numpy as jnp
from jax.experimental import pallas as pl
from jax.experimental.pallas import tpu as pltpu

_LANES = 128


def _fused_decoder_kernel(*refs, num_layers: int):
    """Whole decoder in one kernel: x -> (Linear -> SiLU)*(n-1) -> Linear.

    refs layout: (x_ref, w0, b0, w1, b1, ..., w_{n-1}, b_{n-1}, o_ref).
    Everything is VMEM-resident; intermediate activations never leave chip.
    """
    x_ref = refs[0]
    o_ref = refs[-1]
    wb_refs = refs[1:-1]

    x = x_ref[...].astype(jnp.float32)
    for i in range(num_layers):
        w = wb_refs[2 * i][...].astype(jnp.float32)
        b = wb_refs[2 * i + 1][...].astype(jnp.float32)   # (1, Dout), read once
        x = jnp.dot(x, w, preferred_element_type=jnp.float32) + b
        if i < num_layers - 1:
            # SiLU(x) = x * sigmoid(x); sigmoid on the EUP, mul on the VPU.
            x = x * jax.nn.sigmoid(x)
    o_ref[...] = x.astype(o_ref.dtype)


def variational_decoder_forward(z: jax.Array, params) -> jax.Array:
    """Fused forward pass: Linear -> SiLU -> ... -> Linear (no act on last)."""
    B, Din = z.shape
    n = len(params)
    Dout = params[-1][0].shape[1]

    # Lane-dense final store: pad the last layer's output dim up to a multiple
    # of 128 with zero columns; slice the pad off after the kernel.
    Dout_pad = ((Dout + _LANES - 1) // _LANES) * _LANES
    pad = Dout_pad - Dout

    flat_inputs = [z]
    for i, (w, b) in enumerate(params):
        if i == n - 1 and pad:
            w = jnp.pad(w, ((0, 0), (0, pad)))
            b = jnp.pad(b, (0, pad))
        flat_inputs.append(w)
        flat_inputs.append(b.reshape(1, -1))

    # Batch tiling: weights are grid-invariant (same block every step) and stay
    # resident; activations are streamed per 128-row block for large batches.
    if B >= 256 and B % 128 == 0:
        block_b = 128
    else:
        block_b = B
    grid = (B // block_b,)

    in_specs = [pl.BlockSpec((block_b, Din), lambda i: (i, 0))]
    for i, (w, _b) in enumerate(params):
        din = w.shape[0]
        dout = w.shape[1] + (pad if i == n - 1 else 0)
        in_specs.append(pl.BlockSpec((din, dout), lambda i: (0, 0)))
        in_specs.append(pl.BlockSpec((1, dout), lambda i: (0, 0)))

    out_padded = pl.pallas_call(
        functools.partial(_fused_decoder_kernel, num_layers=n),
        out_shape=jax.ShapeDtypeStruct((B, Dout_pad), z.dtype),
        grid_spec=pltpu.PrefetchScalarGridSpec(
            num_scalar_prefetch=0,
            grid=grid,
            in_specs=in_specs,
            out_specs=pl.BlockSpec((block_b, Dout_pad), lambda i: (i, 0)),
        ),
        compiler_params=pltpu.CompilerParams(
            dimension_semantics=("parallel",)),
    )(*flat_inputs)

    return out_padded[:, :Dout] if pad else out_padded


def init_decoder_params(key, decoder_shape, hidden_dim, dtype=jnp.float32):
    """Deterministic init matching torch.nn.Linear's shapes.

    Returns list of (W[in, out], b[out]) -- W is stored transposed relative to
    PyTorch's (out, in) convention; the kernel computes x @ W + b.
    """
    full_shape = (hidden_dim, *decoder_shape)
    params = []
    for i in range(len(full_shape) - 1):
        fan_in, fan_out = full_shape[i], full_shape[i + 1]
        key, kw, kb = jax.random.split(key, 3)
        bound = 1.0 / (fan_in ** 0.5)  # PyTorch default: U(-1/sqrt(fan_in), +)
        w = jax.random.uniform(kw, (fan_in, fan_out), dtype, minval=-bound, maxval=bound)
        b = jax.random.uniform(kb, (fan_out,), dtype, minval=-bound, maxval=bound)
        params.append((w, b))
    return params


def _reference_forward(z, params):
    """Pure-JAX reference for correctness checking."""
    x = z
    n = len(params)
    for idx, (w, b) in enumerate(params):
        x = x @ w + b
        if idx < n - 1:
            x = x * jax.nn.sigmoid(x)
    return x


if __name__ == "__main__":
    key = jax.random.PRNGKey(0)
    k_params, k_z = jax.random.split(key)

    batch = 8
    hidden_dim = 32
    decoder_shape = (64, 48, 16)   # layers: 32->64 (SiLU), 64->48 (SiLU), 48->16

    params = init_decoder_params(k_params, decoder_shape, hidden_dim)
    z = jax.random.normal(k_z, (batch, hidden_dim), dtype=jnp.float32)

    out = variational_decoder_forward(z, params)
    out = jax.block_until_ready(out)

    ref = _reference_forward(z, params)
    assert out.shape == (batch, decoder_shape[-1]), out.shape
    assert jnp.allclose(out, ref, atol=1e-5, rtol=1e-5), "mismatch vs reference"

    print("KERNEL_OK")
</pallas_src>

<mosaic_0001>
module attributes {stable_mosaic.version = 11 : i64} {
  func.func @_fused_decoder_kernel(%arg0: i32, %arg1: memref<8x32xf32, #tpu.memory_space<vmem>>, %arg2: memref<32x64xf32, #tpu.memory_space<vmem>>, %arg3: memref<1x64xf32, #tpu.memory_space<vmem>>, %arg4: memref<64x48xf32, #tpu.memory_space<vmem>>, %arg5: memref<1x48xf32, #tpu.memory_space<vmem>>, %arg6: memref<48x128xf32, #tpu.memory_space<vmem>>, %arg7: memref<1x128xf32, #tpu.memory_space<vmem>>, %arg8: memref<8x128xf32, #tpu.memory_space<vmem>>) attributes {dimension_semantics = [#tpu.dimension_semantics<parallel>], iteration_bounds = array<i64: 1>, scalar_prefetch = 0 : i64, scratch_operands = 0 : i64, tpu.core_type = #tpu.core_type<tc>, window_params = [{transform_indices = @transform_0, window_bounds = array<i64: 8, 32>}, {pipeline_mode = #tpu.pipeline_mode<synchronous>, transform_indices = @transform_1, window_bounds = array<i64: 32, 64>}, {pipeline_mode = #tpu.pipeline_mode<synchronous>, transform_indices = @transform_2, window_bounds = array<i64: 1, 64>}, {pipeline_mode = #tpu.pipeline_mode<synchronous>, transform_indices = @transform_3, window_bounds = array<i64: 64, 48>}, {pipeline_mode = #tpu.pipeline_mode<synchronous>, transform_indices = @transform_4, window_bounds = array<i64: 1, 48>}, {pipeline_mode = #tpu.pipeline_mode<synchronous>, transform_indices = @transform_5, window_bounds = array<i64: 48, 128>}, {pipeline_mode = #tpu.pipeline_mode<synchronous>, transform_indices = @transform_6, window_bounds = array<i64: 1, 128>}, {transform_indices = @transform_7, window_bounds = array<i64: 8, 128>}]} {
    %c0 = arith.constant 0 : index
    %c0_0 = arith.constant 0 : index
    %0 = vector.load %arg1[%c0, %c0_0] : memref<8x32xf32, #tpu.memory_space<vmem>>, vector<8x32xf32>
    %c0_1 = arith.constant 0 : index
    %c0_2 = arith.constant 0 : index
    %1 = vector.load %arg2[%c0_1, %c0_2] : memref<32x64xf32, #tpu.memory_space<vmem>>, vector<32x64xf32>
    %c0_3 = arith.constant 0 : index
    %c0_4 = arith.constant 0 : index
    %2 = vector.load %arg3[%c0_3, %c0_4] : memref<1x64xf32, #tpu.memory_space<vmem>>, vector<1x64xf32>
    %cst = arith.constant dense<0.000000e+00> : vector<8x64xf32>
    %3 = tpu.matmul %0, %1, %cst {dimension_numbers = #tpu.dot_dimension_numbers<[1], [0], [0], [1], [0, 0, 1, 1], [], []>} : vector<8x32xf32>, vector<32x64xf32>, vector<8x64xf32> -> vector<8x64xf32>
    %4 = vector.broadcast %2 : vector<1x64xf32> to vector<8x64xf32>
    %5 = arith.addf %3, %4 : vector<8x64xf32>
    %6 = arith.negf %5 : vector<8x64xf32>
    %7 = math.exp %6 : vector<8x64xf32>
    %cst_5 = arith.constant 1.000000e+00 : f32
    %8 = vector.broadcast %cst_5 : f32 to vector<8x64xf32>
    %9 = arith.addf %8, %7 : vector<8x64xf32>
    %10 = arith.divf %8, %9 : vector<8x64xf32>
    %11 = arith.mulf %5, %10 : vector<8x64xf32>
    %c0_6 = arith.constant 0 : index
    %c0_7 = arith.constant 0 : index
    %12 = vector.load %arg4[%c0_6, %c0_7] : memref<64x48xf32, #tpu.memory_space<vmem>>, vector<64x48xf32>
    %c0_8 = arith.constant 0 : index
    %c0_9 = arith.constant 0 : index
    %13 = vector.load %arg5[%c0_8, %c0_9] : memref<1x48xf32, #tpu.memory_space<vmem>>, vector<1x48xf32>
    %cst_10 = arith.constant dense<0.000000e+00> : vector<8x48xf32>
    %14 = tpu.matmul %11, %12, %cst_10 {dimension_numbers = #tpu.dot_dimension_numbers<[1], [0], [0], [1], [0, 0, 1, 1], [], []>} : vector<8x64xf32>, vector<64x48xf32>, vector<8x48xf32> -> vector<8x48xf32>
    %15 = vector.broadcast %13 : vector<1x48xf32> to vector<8x48xf32>
    %16 = arith.addf %14, %15 : vector<8x48xf32>
    %17 = arith.negf %16 : vector<8x48xf32>
    %18 = math.exp %17 : vector<8x48xf32>
    %cst_11 = arith.constant 1.000000e+00 : f32
    %19 = vector.broadcast %cst_11 : f32 to vector<8x48xf32>
    %20 = arith.addf %19, %18 : vector<8x48xf32>
    %21 = arith.divf %19, %20 : vector<8x48xf32>
    %22 = arith.mulf %16, %21 : vector<8x48xf32>
    %c0_12 = arith.constant 0 : index
    %c0_13 = arith.constant 0 : index
    %23 = vector.load %arg6[%c0_12, %c0_13] : memref<48x128xf32, #tpu.memory_space<vmem>>, vector<48x128xf32>
    %c0_14 = arith.constant 0 : index
    %c0_15 = arith.constant 0 : index
    %24 = vector.load %arg7[%c0_14, %c0_15] : memref<1x128xf32, #tpu.memory_space<vmem>>, vector<1x128xf32>
    %cst_16 = arith.constant dense<0.000000e+00> : vector<8x128xf32>
    %25 = tpu.matmul %22, %23, %cst_16 {dimension_numbers = #tpu.dot_dimension_numbers<[1], [0], [0], [1], [0, 0, 1, 1], [], []>} : vector<8x48xf32>, vector<48x128xf32>, vector<8x128xf32> -> vector<8x128xf32>
    %26 = vector.broadcast %24 : vector<1x128xf32> to vector<8x128xf32>
    %27 = arith.addf %25, %26 : vector<8x128xf32>
    %c0_17 = arith.constant 0 : index
    %c0_18 = arith.constant 0 : index
    %28 = vector.load %arg8[%c0_17, %c0_18] : memref<8x128xf32, #tpu.memory_space<vmem>>, vector<8x128xf32>
    tpu.vector_store %arg8[%c0_17, %c0_18], %27 {strides = array<i32>} : memref<8x128xf32, #tpu.memory_space<vmem>>, vector<8x128xf32>,
    return
  }
  func.func @transform_0(%arg0: i32) -> (i32, i32) {
    %c0_i32 = arith.constant 0 : i32
    %c0_i32_0 = arith.constant 0 : i32
    return %arg0, %c0_i32 : i32, i32
  }
  func.func @transform_1(%arg0: i32) -> (i32, i32) {
    %c0_i32 = arith.constant 0 : i32
    %c0_i32_0 = arith.constant 0 : i32
    %c0_i32_1 = arith.constant 0 : i32
    return %c0_i32, %c0_i32_0 : i32, i32
  }
  func.func @transform_2(%arg0: i32) -> (i32, i32) {
    %c0_i32 = arith.constant 0 : i32
    %c0_i32_0 = arith.constant 0 : i32
    %c0_i32_1 = arith.constant 0 : i32
    return %c0_i32, %c0_i32_0 : i32, i32
  }
  func.func @transform_3(%arg0: i32) -> (i32, i32) {
    %c0_i32 = arith.constant 0 : i32
    %c0_i32_0 = arith.constant 0 : i32
    %c0_i32_1 = arith.constant 0 : i32
    return %c0_i32, %c0_i32_0 : i32, i32
  }
  func.func @transform_4(%arg0: i32) -> (i32, i32) {
    %c0_i32 = arith.constant 0 : i32
    %c0_i32_0 = arith.constant 0 : i32
    %c0_i32_1 = arith.constant 0 : i32
    return %c0_i32, %c0_i32_0 : i32, i32
  }
  func.func @transform_5(%arg0: i32) -> (i32, i32) {
    %c0_i32 = arith.constant 0 : i32
    %c0_i32_0 = arith.constant 0 : i32
    %c0_i32_1 = arith.constant 0 : i32
    return %c0_i32, %c0_i32_0 : i32, i32
  }
  func.func @transform_6(%arg0: i32) -> (i32, i32) {
    %c0_i32 = arith.constant 0 : i32
    %c0_i32_0 = arith.constant 0 : i32
    %c0_i32_1 = arith.constant 0 : i32
    return %c0_i32, %c0_i32_0 : i32, i32
  }
  func.func @transform_7(%arg0: i32) -> (i32, i32) {
    %c0_i32 = arith.constant 0 : i32
    %c0_i32_0 = arith.constant 0 : i32
    return %arg0, %c0_i32 : i32, i32
  }
}

</mosaic_0001>

<bundles_post_ra>
// kernel: tpu_custom_call.1
= control target key start
LH: loop header
LB: loop body
LE: loop exit
PB: predicated region body
PF: predicated region fallthrough
CT: control target
= control target key end

     0   :  { %v455_v3 = vmov 0.0|0.0   ;;  %vm456_vm0 = vmmov 0   ;;  %v457_v6 = vmov 0.0   ;;  %s577_s0 = inlined_call_operand.vmem [shape: f32[8,32], index: 0, kind: input, shape index: {}]   ;;  %s578_s1 = inlined_call_operand.vmem [shape: f32[32,64], index: 1, kind: input, shape index: {}]   ;;  %s579_s2 = inlined_call_operand.vmem [shape: f32[1,64], index: 2, kind: input, shape index: {}]   ;;  %s580_s3 = inlined_call_operand.vmem [shape: f32[64,48], index: 3, kind: input, shape index: {}]   ;;  %s581_s4 = inlined_call_operand.vmem [shape: f32[1,48], index: 4, kind: input, shape index: {}]   ;;  %s582_s5 = inlined_call_operand.vmem [shape: f32[48,128], index: 5, kind: input, shape index: {}]   ;;  %s583_s6 = inlined_call_operand.vmem [shape: f32[1,128], index: 6, kind: input, shape index: {}]   ;;  %s584_s7 = inlined_call_operand.hbm [shape: f32[8,128], index: 7, kind: output, shape index: {}]  }
   0x1   :  { %v28_v0 = vld [vmem:[%s578_s1] sm:$0xff]  ;;  %v29_v1 = vld [vmem:[%s578_s1 + $0x8] sm:$0xff]  ;;  %v30_v2 = vld [vmem:[%s578_s1 + $0x10] sm:$0xff]  ;;  %392 = vmatprep.subr.bf16.mxu0 %v455_v3  ;;  %355 = vmatprep.mubr.msk.f32.mxu0 %vm456_vm0, %v457_v6 }
   0x2   :  { %v393_v4 = vpack.c.bf16 %v29_v1, %v28_v0  ;;  %v31_v5 = vld [vmem:[%s578_s1 + $0x18] sm:$0xff]  ;;  %398 = vmatprep.subr.bf16.mxu1 %v455_v3  ;;  %374 = vmatprep.mubr.msk.f32.mxu1 %vm456_vm0, %v457_v6 }
   0x3   :  { %12 = vsyncpa [#allocation3], 0  ;;  %v396_v7 = vpack.c.bf16 %v31_v5, %v30_v2  ;;  %v27_v8 = vld [vmem:[%s577_s0] sm:$0xff]  ;;  %vm39_vm1 = vcmask 261120   ;;  %v121_v10 = vld [vmem:[%s580_s3 + $0x8] sm:$0xff]  ;;  %vm135_vm2 = vcmask 523264  }
   0x4   :  { %394 = vmatpush3.bf16.msra.mxu0 %v393_v4  ;;  %v120_v9 = vld [vmem:[%s580_s3] sm:$0xff]  ;;  %v122_v12 = vld [vmem:[%s580_s3 + $0x10] sm:$0xff]  ;;  %v123_v13 = vld [vmem:[%s580_s3 + $0x18] sm:$0xff]  ;;  %vm229_vm3 = vcmask 392192   ;;  %s458_s0 = smov [#allocation2]  }
   0x5   :  { %395 = vmatprep.subr.bf16.mxu0 %v455_v3  ;;  %v399_v11 = vpack.c.bf16 %v121_v10, %v120_v9  ;;  %v402_v14 = vpack.c.bf16 %v123_v13, %v122_v12  ;;  %v124_v15 = vld [vmem:[%s580_s3 + $0x20] sm:$0xff]  ;;  %v125_v16 = vld [vmem:[%s580_s3 + $0x28] sm:$0xff]  ;;  %v126_v18 = vld [vmem:[%s580_s3 + $0x30] sm:$0xff]  ;;  %s310_s16 = sshll.u32 %s458_s0, 4  ;;  %s311_s16 = int_to_ptr.vmem [resolvable:$true] %s310_s16 }
   0x6   :  { %v405_v17 = vpack.c.bf16 %v125_v16, %v124_v15  ;;  %v127_v19 = vld [vmem:[%s580_s3 + $0x38] sm:$0xff]  ;;  %v318_v21 = vld [vmem:[%s579_s2] ss:$0 sm:$0xff]  ;;  %v217_v31 = vld [vmem:[%s582_s5 + $0x8] sm:$0xff]  ;;  %p436_p1 = scmp.lt.s32.totalorder %s311_s16, %s311_s16 }
   0x7   :  { %400 = vmatpush3.bf16.msra.mxu1 %v399_v11  ;;  %v408_v20 = vpack.c.bf16 %v127_v19, %v126_v18  ;;  %v216_v30 = vld [vmem:[%s582_s5] sm:$0xff]  ;;  %v218_v33 = vld [vmem:[%s582_s5 + $0x10] sm:$0xff]  ;;  %v219_v34 = vld [vmem:[%s582_s5 + $0x18] sm:$0xff] }
   0x8   :  { %397 = vmatpush3.bf16.msra.mxu0 %v396_v7  ;;  %401 = vmatprep.subr.bf16.mxu1 %v455_v3  ;;  %v411_v32 = vpack.c.bf16 %v217_v31, %v216_v30  ;;  %v414_v35 = vpack.c.bf16 %v219_v34, %v218_v33  ;;  %v220_v36 = vld [vmem:[%s582_s5 + $0x20] sm:$0xff]  ;;  %v221_v37 = vld [vmem:[%s582_s5 + $0x28] sm:$0xff] }
   0x9   :  { %410 = vmatprep.subr.bf16.mxu0 %v455_v3  ;;  %v417_v38 = vpack.c.bf16 %v221_v37, %v220_v36  ;;  %v321_v39 = vld [vmem:[%s581_s4] ss:$0 sm:$0xff]  ;;  %s431_s4 = scalar_lea.vmem %s311_s16, 128 }
   0xa   :  { %v324_v48 = vld [vmem:[%s583_s6] ss:$0 sm:$0xff]  ;;  %p432_p0 = scmp.ne.s32.totalorder %s311_s16, %s431_s4  ;;  %p437_p2 = scmp.lt.s32.totalorder %s431_s4, %s431_s4 }
   0xb   :  { %356 = vmatmul.mubr.msk.f32.vlgmr.msra.gmra.mrb[0].mxu0 %vm39_vm1, %v27_v8  ;;  %403 = vmatpush3.bf16.msra.mxu1 %v402_v14 }
   0xc   :  { %389 = vmatprep.mubr.msk.f32.mxu0 %vm456_vm0, %v457_v6  ;;  %404 = vmatprep.subr.bf16.mxu1 %v455_v3  ;;  %p438_p3 = por %p437_p2, %p436_p1 }
   0xd   :  { %412 = vmatpush3.bf16.msra.mxu0 %v411_v32 }
   0xe   :  { %413 = vmatprep.subr.bf16.mxu0 %v455_v3  ;;  %p439_p4 = pnand %p438_p3, %p432_p0 }
   0xf   :  { %406 = vmatpush3.bf16.msra.mxu1 %v405_v17 }
  0x10   :  { %407 = vmatprep.subr.bf16.mxu1 %v455_v3 }
  0x11   :  { %415 = vmatpush3.bf16.msra.mxu0 %v414_v35 }
  0x12   :  { %416 = vmatprep.subr.bf16.mxu0 %v455_v3 }
  0x13   :  { %409 = vmatpush3.bf16.msra.mxu1 %v408_v20 }
  0x15   :  { %418 = vmatpush3.bf16.msra.mxu0 %v417_v38 }
  0xde   :  { %v109_v22 = vpop.f32.mrb[0].mxu0 }
  0xdf   :  { %v110_v23 = vadd.f32 %v318_v21, %v109_v22  ;;  %v357_v24 = vpop.f32.mrb[1].mxu0 }
  0xe1   :  { %v320_v25 = vmul.f32 -1.442695, %v110_v23 }
  0xe3   :  { %423 = vpow2.f32 %v320_v25 }
  0xed   :  { %v424_v26 = vpop.eup %423 }
  0xee   :  { %v116_v27 = vadd.f32 1.0, %v424_v26 }
  0xf0   :  { %425 = vrcp.f32 %v116_v27 }
  0xfa   :  { %v426_v28 = vpop.eup %425 }
  0xfb   :  { %v119_v29 = vmul.f32 %v426_v28, %v110_v23 }
  0xfd   :  { %375 = vmatmul.mubr.msk.f32.vlgmr.msra.gmra.mrb[0].mxu1 %vm135_vm2, %v119_v29 }
 0x1d0   :  { %v205_v40 = vpop.f32.mrb[0].mxu1 }
 0x1d1   :  { %v206_v41 = vadd.f32 %v321_v39, %v205_v40  ;;  %v376_v42 = vpop.f32.mrb[1].mxu1 }
 0x1d3   :  { %v323_v43 = vmul.f32 -1.442695, %v206_v41 }
 0x1d5   :  { %427 = vpow2.f32 %v323_v43 }
 0x1df   :  { %v428_v44 = vpop.eup %427 }
 0x1e0   :  { %v212_v45 = vadd.f32 1.0, %v428_v44 }
 0x1e2   :  { %429 = vrcp.f32 %v212_v45 }
 0x1ec   :  { %v430_v46 = vpop.eup %429 }
 0x1ed   :  { %v215_v47 = vmul.f32 %v430_v46, %v206_v41 }
 0x1ef   :  { %390 = vmatmul.mubr.msk.f32.vlgmr.msra.gmra.mrb[2].mxu0 %vm229_vm3, %v215_v47 }
 0x2c2   :  { %v299_v49 = vpop.f32.mrb[2].mxu0 }
 0x2c3   :  { %v300_v50 = vadd.f32 %v324_v48, %v299_v49  ;;  %v391_v51 = vpop.f32.mrb[3].mxu0 }
 0x2c5   :  { %303 = vst [vmem:[#allocation2] sm:$0xff] %v300_v50 }
 0x2c6   :  { %442 = shalt.err (!%p439_p4)
}
 0x2c7   :  { %s443_s19 = scalar_lea.hbm %s584_s7, 128 }
 0x2c8   :  { %p444_p5 = scmp.ne.s32.totalorder %s584_s7, %s443_s19  ;;  %p447_p6 = scmp.lt.u32.totalorder %s443_s19, %s584_s7 }
 0x2ca   :  { %p449_p7 = pnand %p447_p6, %p444_p5 }
 0x2cc   :  { %452 = shalt.err (!%p449_p7)
}
 0x2cd   :  { %313 = dma.vmem_to_hbm [thread:$0]  %s311_s16, 128, %s584_s7, [#allocation3]  }
 0x2ce   :  { %453 = dma.done.wait [#allocation3], 128  }
 0x2cf   :  { %454 = vsyncadd [#allocation3], 4294967168 }
 0x2d0   :  { %317 = vsyncpa [#allocation3], 1 }

</bundles_post_ra>
